<compile_context>
chip_gen: v6e
topology: v6e:2x2x1
jax: 0.10.0
libtpu: 0.0.40
codegen_flags: <defaults>
</compile_context>

<pallas_src>
import functools

import jax
import jax.numpy as jnp
from jax.experimental import pallas as pl
from jax.experimental.pallas import tpu as pltpu


def actor_kernel(x_ref, w1_ref, w2h_ref, bias_ref, out_ref, *,
                 hidden_dim, action_dim):
    x = x_ref[...]                      # (TB, state_dim)
    w1 = w1_ref[...]                    # (state_dim, hidden)
    w2h = w2h_ref[...]                  # (hidden, hidden + 2*action_dim)
    bias = bias_ref[...]                # (1, 2*hidden + 2*action_dim)

    # Static slices of the packed parameter buffers.
    b1 = bias[:, 0:hidden_dim]
    b2 = bias[:, hidden_dim:2 * hidden_dim]
    bh = bias[:, 2 * hidden_dim:]
    w2 = w2h[:, 0:hidden_dim]
    wh = w2h[:, hidden_dim:]

    # fc1 + ReLU
    h1 = jnp.dot(x, w1, preferred_element_type=jnp.float32) + b1
    h1 = jnp.maximum(h1, 0.0)

    # fc2 + ReLU
    h2 = jnp.dot(h1, w2, preferred_element_type=jnp.float32) + b2
    h2 = jnp.maximum(h2, 0.0)

    # Fused heads: [mu | log_std] in one matmul -> (TB, 2*action_dim)
    heads = jnp.dot(h2, wh, preferred_element_type=jnp.float32) + bh

    # Clamp only the log_std columns (col >= action_dim) to [-20, 2], then write
    # the whole slab with one store.
    cols = jax.lax.broadcasted_iota(jnp.int32, heads.shape, 1)
    clamped = jnp.clip(heads, -20.0, 2.0)
    out = jnp.where(cols >= action_dim, clamped, heads)

    out_ref[...] = out.astype(out_ref.dtype)


def actor_forward(state, params):
    """state: (B, state_dim) f32.  Returns (mu, log_std), each (B, action_dim)."""
    w1, b1, w2, b2, wm, bm, wl, bl = params
    B, state_dim = state.shape
    hidden_dim = w1.shape[1]
    action_dim = wm.shape[1]

    # --- parameter packing (wrapper-side layout plumbing) ---
    # Heads fused along the output axis; second-layer weight shares one buffer.
    w_heads = jnp.concatenate([wm, wl], axis=1)            # (hidden, 2*A)
    w2h = jnp.concatenate([w2, w_heads], axis=1)           # (hidden, hidden + 2*A)
    bias = jnp.concatenate([b1, b2, bm, bl], axis=1)       # (1, 2*hidden + 2*A)

    # --- batch tiling: TB multiple of 8 (sublane), capped at MXU-native 256 ---
    if B <= 256:
        tb = B                       # single tile; block == full array, always legal
    else:
        tb = 256
    grid = (pl.cdiv(B, tb),)

    vmem = pltpu.MemorySpace.VMEM
    kernel = functools.partial(actor_kernel,
                               hidden_dim=hidden_dim, action_dim=action_dim)

    out = pl.pallas_call(
        kernel,
        out_shape=jax.ShapeDtypeStruct((B, 2 * action_dim), jnp.float32),
        grid=grid,
        in_specs=[
            # activations: streamed over the batch grid
            pl.BlockSpec((tb, state_dim), lambda i: (i, 0), memory_space=vmem),
            # weights / biases: VMEM-resident across all grid steps
            pl.BlockSpec(w1.shape, lambda i: (0, 0), memory_space=vmem),
            pl.BlockSpec(w2h.shape, lambda i: (0, 0), memory_space=vmem),
            pl.BlockSpec(bias.shape, lambda i: (0, 0), memory_space=vmem),
        ],
        out_specs=pl.BlockSpec((tb, 2 * action_dim), lambda i: (i, 0),
                               memory_space=vmem),
        compiler_params=pltpu.CompilerParams(
            # batch tiles are independent -> megacore/2-TC sharding on v7x
            dimension_semantics=("parallel",),
        ),
    )(state, w1, w2h, bias)

    mu = out[:, :action_dim]
    log_std = out[:, action_dim:]
    return mu, log_std


def init_actor_params(key, state_dim, action_dim, hidden_dim):
    """Deterministic init, mirroring nn.Linear's U(-1/sqrt(fan_in), 1/sqrt(fan_in))."""
    keys = jax.random.split(key, 8)

    def linear(kw, kb, fan_in, fan_out):
        bound = 1.0 / jnp.sqrt(jnp.float32(fan_in))
        w = jax.random.uniform(kw, (fan_in, fan_out), jnp.float32, -bound, bound)
        b = jax.random.uniform(kb, (1, fan_out), jnp.float32, -bound, bound)
        return w, b

    w1, b1 = linear(keys[0], keys[1], state_dim, hidden_dim)
    w2, b2 = linear(keys[2], keys[3], hidden_dim, hidden_dim)
    wm, bm = linear(keys[4], keys[5], hidden_dim, action_dim)
    wl, bl = linear(keys[6], keys[7], hidden_dim, action_dim)
    return (w1, b1, w2, b2, wm, bm, wl, bl)


def actor_forward_ref(state, params):
    """Pure-JAX reference for correctness checking."""
    w1, b1, w2, b2, wm, bm, wl, bl = params
    h1 = jnp.maximum(state @ w1 + b1, 0.0)
    h2 = jnp.maximum(h1 @ w2 + b2, 0.0)
    mu = h2 @ wm + bm
    log_std = jnp.clip(h2 @ wl + bl, -20.0, 2.0)
    return mu, log_std


if __name__ == "__main__":
    batch = 2
    state_dim = 16
    action_dim = 4
    hidden_dim = 32

    key = jax.random.PRNGKey(0)
    k_state, k_params = jax.random.split(key)

    state = jax.random.normal(k_state, (batch, state_dim), jnp.float32)
    params = init_actor_params(k_params, state_dim, action_dim, hidden_dim)

    mu, log_std = actor_forward(state, params)
    jax.block_until_ready((mu, log_std))

    mu_ref, log_std_ref = actor_forward_ref(state, params)
    assert mu.shape == (batch, action_dim)
    assert log_std.shape == (batch, action_dim)
    assert jnp.allclose(mu, mu_ref, atol=1e-5, rtol=1e-5)
    assert jnp.allclose(log_std, log_std_ref, atol=1e-5, rtol=1e-5)

    print("KERNEL_OK")
</pallas_src>

<mosaic_0001>
module attributes {stable_mosaic.version = 11 : i64} {
  func.func @actor_kernel(%arg0: i32, %arg1: memref<2x16xf32, #tpu.memory_space<vmem>>, %arg2: memref<16x32xf32, #tpu.memory_space<vmem>>, %arg3: memref<32x40xf32, #tpu.memory_space<vmem>>, %arg4: memref<1x72xf32, #tpu.memory_space<vmem>>, %arg5: memref<2x8xf32, #tpu.memory_space<vmem>>) attributes {dimension_semantics = [#tpu.dimension_semantics<parallel>], iteration_bounds = array<i64: 1>, scalar_prefetch = 0 : i64, scratch_operands = 0 : i64, tpu.core_type = #tpu.core_type<tc>, window_params = [{transform_indices = @transform_0, window_bounds = array<i64: 2, 16>}, {pipeline_mode = #tpu.pipeline_mode<synchronous>, transform_indices = @transform_1, window_bounds = array<i64: 16, 32>}, {pipeline_mode = #tpu.pipeline_mode<synchronous>, transform_indices = @transform_2, window_bounds = array<i64: 32, 40>}, {pipeline_mode = #tpu.pipeline_mode<synchronous>, transform_indices = @transform_3, window_bounds = array<i64: 1, 72>}, {transform_indices = @transform_4, window_bounds = array<i64: 2, 8>}]} {
    %c0 = arith.constant 0 : index
    %c0_0 = arith.constant 0 : index
    %0 = vector.load %arg1[%c0, %c0_0] : memref<2x16xf32, #tpu.memory_space<vmem>>, vector<2x16xf32>
    %c0_1 = arith.constant 0 : index
    %c0_2 = arith.constant 0 : index
    %1 = vector.load %arg2[%c0_1, %c0_2] : memref<16x32xf32, #tpu.memory_space<vmem>>, vector<16x32xf32>
    %c0_3 = arith.constant 0 : index
    %c0_4 = arith.constant 0 : index
    %2 = vector.load %arg3[%c0_3, %c0_4] : memref<32x40xf32, #tpu.memory_space<vmem>>, vector<32x40xf32>
    %c0_5 = arith.constant 0 : index
    %c0_6 = arith.constant 0 : index
    %3 = vector.load %arg4[%c0_5, %c0_6] : memref<1x72xf32, #tpu.memory_space<vmem>>, vector<1x72xf32>
    %4 = vector.extract_strided_slice %3 {offsets = [0, 0], sizes = [1, 32], strides = [1, 1]} : vector<1x72xf32> to vector<1x32xf32>
    %5 = vector.extract_strided_slice %3 {offsets = [0, 32], sizes = [1, 32], strides = [1, 1]} : vector<1x72xf32> to vector<1x32xf32>
    %6 = vector.extract_strided_slice %3 {offsets = [0, 64], sizes = [1, 8], strides = [1, 1]} : vector<1x72xf32> to vector<1x8xf32>
    %7 = vector.extract_strided_slice %2 {offsets = [0, 0], sizes = [32, 32], strides = [1, 1]} : vector<32x40xf32> to vector<32x32xf32>
    %8 = vector.extract_strided_slice %2 {offsets = [0, 32], sizes = [32, 8], strides = [1, 1]} : vector<32x40xf32> to vector<32x8xf32>
    %cst = arith.constant dense<0.000000e+00> : vector<2x32xf32>
    %9 = tpu.matmul %0, %1, %cst {dimension_numbers = #tpu.dot_dimension_numbers<[1], [0], [0], [1], [0, 0, 1, 1], [], []>} : vector<2x16xf32>, vector<16x32xf32>, vector<2x32xf32> -> vector<2x32xf32>
    %10 = vector.broadcast %4 : vector<1x32xf32> to vector<2x32xf32>
    %11 = arith.addf %9, %10 : vector<2x32xf32>
    %cst_7 = arith.constant 0.000000e+00 : f32
    %12 = vector.broadcast %cst_7 : f32 to vector<2x32xf32>
    %13 = arith.maximumf %11, %12 : vector<2x32xf32>
    %cst_8 = arith.constant dense<0.000000e+00> : vector<2x32xf32>
    %14 = tpu.matmul %13, %7, %cst_8 {dimension_numbers = #tpu.dot_dimension_numbers<[1], [0], [0], [1], [0, 0, 1, 1], [], []>} : vector<2x32xf32>, vector<32x32xf32>, vector<2x32xf32> -> vector<2x32xf32>
    %15 = vector.broadcast %5 : vector<1x32xf32> to vector<2x32xf32>
    %16 = arith.addf %14, %15 : vector<2x32xf32>
    %cst_9 = arith.constant 0.000000e+00 : f32
    %17 = vector.broadcast %cst_9 : f32 to vector<2x32xf32>
    %18 = arith.maximumf %16, %17 : vector<2x32xf32>
    %cst_10 = arith.constant dense<0.000000e+00> : vector<2x8xf32>
    %19 = tpu.matmul %18, %8, %cst_10 {dimension_numbers = #tpu.dot_dimension_numbers<[1], [0], [0], [1], [0, 0, 1, 1], [], []>} : vector<2x32xf32>, vector<32x8xf32>, vector<2x8xf32> -> vector<2x8xf32>
    %20 = vector.broadcast %6 : vector<1x8xf32> to vector<2x8xf32>
    %21 = arith.addf %19, %20 : vector<2x8xf32>
    %22 = tpu.iota {dimensions = array<i32: 1>} : vector<2x8xi32>
    %cst_11 = arith.constant -2.000000e+01 : f32
    %cst_12 = arith.constant 2.000000e+00 : f32
    %23 = vector.broadcast %cst_11 : f32 to vector<2x8xf32>
    %24 = arith.maximumf %23, %21 : vector<2x8xf32>
    %25 = vector.broadcast %cst_12 : f32 to vector<2x8xf32>
    %26 = arith.minimumf %25, %24 : vector<2x8xf32>
    %c4_i32 = arith.constant 4 : i32
    %27 = vector.broadcast %c4_i32 : i32 to vector<2x8xi32>
    %28 = arith.cmpi sge, %22, %27 : vector<2x8xi32>
    %29 = arith.select %28, %26, %21 : vector<2x8xi1>, vector<2x8xf32>
    %c0_13 = arith.constant 0 : index
    %c0_14 = arith.constant 0 : index
    %30 = vector.load %arg5[%c0_13, %c0_14] : memref<2x8xf32, #tpu.memory_space<vmem>>, vector<2x8xf32>
    tpu.vector_store %arg5[%c0_13, %c0_14], %29 {strides = array<i32>} : memref<2x8xf32, #tpu.memory_space<vmem>>, vector<2x8xf32>,
    return
  }
  func.func @transform_0(%arg0: i32) -> (i32, i32) {
    %c0_i32 = arith.constant 0 : i32
    %c0_i32_0 = arith.constant 0 : i32
    return %arg0, %c0_i32 : i32, i32
  }
  func.func @transform_1(%arg0: i32) -> (i32, i32) {
    %c0_i32 = arith.constant 0 : i32
    %c0_i32_0 = arith.constant 0 : i32
    %c0_i32_1 = arith.constant 0 : i32
    return %c0_i32, %c0_i32_0 : i32, i32
  }
  func.func @transform_2(%arg0: i32) -> (i32, i32) {
    %c0_i32 = arith.constant 0 : i32
    %c0_i32_0 = arith.constant 0 : i32
    %c0_i32_1 = arith.constant 0 : i32
    return %c0_i32, %c0_i32_0 : i32, i32
  }
  func.func @transform_3(%arg0: i32) -> (i32, i32) {
    %c0_i32 = arith.constant 0 : i32
    %c0_i32_0 = arith.constant 0 : i32
    %c0_i32_1 = arith.constant 0 : i32
    return %c0_i32, %c0_i32_0 : i32, i32
  }
  func.func @transform_4(%arg0: i32) -> (i32, i32) {
    %c0_i32 = arith.constant 0 : i32
    %c0_i32_0 = arith.constant 0 : i32
    return %arg0, %c0_i32 : i32, i32
  }
}

</mosaic_0001>

<bundles_post_ra>
// kernel: tpu_custom_call.1
= control target key start
LH: loop header
LB: loop body
LE: loop exit
PB: predicated region body
PF: predicated region fallthrough
CT: control target
= control target key end

     0   :  { %9 = vsyncpa [#allocation3], 0  ;;  %s535_s0 = inlined_call_operand.hbm [shape: f32[2,16], index: 0, kind: input, shape index: {}]   ;;  %s536_s1 = inlined_call_operand.hbm [shape: f32[16,32], index: 1, kind: input, shape index: {}]   ;;  %s537_s2 = inlined_call_operand.hbm [shape: f32[32,40], index: 2, kind: input, shape index: {}]   ;;  %s538_s3 = inlined_call_operand.vmem [shape: f32[1,72], index: 3, kind: input, shape index: {}]   ;;  %s539_s4 = inlined_call_operand.hbm [shape: f32[2,8], index: 4, kind: output, shape index: {}]  }
   0x1   :  { %10 = vsyncpa [#allocation6], 0 }
   0x2   :  { %11 = vsyncpa [#allocation4], 0  ;;  %s482_s15 = smov [#allocation5]  }
   0x3   :  { %s27_s16 = sshll.u32 %s482_s15, 4  ;;  %s28_s16 = int_to_ptr.vmem [resolvable:$true] %s27_s16 }
   0x4   :  { %s404_s17 = scalar_lea.vmem %s28_s16, 256  ;;  %p409_p1 = scmp.lt.s32.totalorder %s28_s16, %s28_s16 }
   0x5   :  { %p405_p0 = scmp.ne.s32.totalorder %s28_s16, %s404_s17  ;;  %p410_p2 = scmp.lt.s32.totalorder %s404_s17, %s404_s17 }
   0x7   :  { %p411_p3 = por %p410_p2, %p409_p1 }
   0x9   :  { %p412_p4 = pnand %p411_p3, %p405_p0 }
   0xb   :  { %415 = shalt.err (!%p412_p4)
}
   0xc   :  { %s483_s18 = smov 128   ;;  %s484_s19 = smov 8  }
   0xd   :  { %33 = dma.hbm_to_vmem [thread:$0]  %s536_s1, 256, %s28_s16, [#allocation6], %s483_s18, %s483_s18, %s484_s19  }
   0xe   :  { %s485_s22 = smov [#allocation2]   ;;  %s486_s24 = smov [#allocation7]  }
   0xf   :  { %s18_s23 = sshll.u32 %s485_s22, 4  ;;  %s39_s25 = sshll.u32 %s486_s24, 4  ;;  %s19_s23 = int_to_ptr.vmem [resolvable:$true] %s18_s23  ;;  %s40_s25 = int_to_ptr.vmem [resolvable:$true] %s39_s25 }
  0x10   :  { %s424_s26 = scalar_lea.vmem %s19_s23, 32  ;;  %p429_p6 = scmp.lt.s32.totalorder %s19_s23, %s19_s23 }
  0x11   :  { %p425_p5 = scmp.ne.s32.totalorder %s19_s23, %s424_s26  ;;  %p430_p7 = scmp.lt.s32.totalorder %s424_s26, %s424_s26 }
  0x13   :  { %p431_p8 = por %p430_p7, %p429_p6 }
  0x15   :  { %p432_p9 = pnand %p431_p8, %p425_p5 }
  0x17   :  { %435 = shalt.err (!%p432_p9)
}
  0x18   :  { %21 = dma.hbm_to_vmem [thread:$0]  %s535_s0, 32, %s19_s23, [#allocation3]  }
  0x19   :  { %s444_s29 = scalar_lea.vmem %s40_s25, 512  ;;  %p449_p11 = scmp.lt.s32.totalorder %s40_s25, %s40_s25 }
  0x1a   :  { %p445_p10 = scmp.ne.s32.totalorder %s40_s25, %s444_s29  ;;  %p450_p12 = scmp.lt.s32.totalorder %s444_s29, %s444_s29 }
  0x1c   :  { %p451_p13 = por %p450_p12, %p449_p11 }
  0x1e   :  { %p452_p0 = pnand %p451_p13, %p445_p10 }
  0x20   :  { %455 = shalt.err (!%p452_p0)
}
  0x21   :  { %45 = dma.hbm_to_vmem [thread:$0]  %s537_s2, 512, %s40_s25, [#allocation6], %s483_s18, %s483_s18, %s484_s19  }
  0x22   :  { %476 = dma.done.wait [#allocation3], 32  }
  0x23   :  { %477 = vsyncadd [#allocation3], 4294967264 }
  0x24   :  { %478 = dma.done.wait [#allocation6], 768  }
  0x25   :  { %479 = vsyncadd [#allocation6], 4294966528  ;;  %v487_v0 = vmov 0.0   ;;  %vm488_vm0 = vmmov 0   ;;  %v59_v1 = vld [vmem:[#allocation5 + $0x8] sm:$0xff]  ;;  %v58_v2 = vld [vmem:[#allocation5] sm:$0xff]  ;;  %v316_v22 = vlaneseq }
  0x26   :  { %357 = vmatprep.subr.mxu0 %v487_v0  ;;  %361 = vmatprep.mubr.msk.f32.mxu0 %vm488_vm0, %v487_v0  ;;  %v57_v3 = vld [vmem:[#allocation2] sm:$0x3]  ;;  %vm71_vm1 = vcmask 130048   ;;  %v63_v4 = vld [vmem:[#allocation7 + $0x18] sm:$0xff]  ;;  %v62_v5 = vld [vmem:[#allocation7 + $0x10] sm:$0xff]  ;;  %s489_s5 = smov 96  }
  0x27   :  { %364 = vmatprep.subr.mxu1 %v487_v0  ;;  %372 = vmatprep.mubr.msk.f32.mxu1 %vm488_vm0, %v487_v0  ;;  %v61_v6 = vld [vmem:[#allocation7 + $0x8] sm:$0xff]  ;;  %v60_v7 = vld [vmem:[#allocation7] sm:$0xff]  ;;  %vm149_vm2 = vcmask 261120   ;;  %v317_v25 = vand.u32 127, %v316_v22  ;;  %s491_s6 = smov [#allocation8]   ;;  %vm322_vm4 = vcmask 58368  }
  0x28   :  { %358 = vmatpush3.msra.mxu0 %v59_v1  ;;  %365 = vmatpush3.msra.mxu1 %v63_v4  ;;  %v340_v8 = vld [vmem:[%s538_s3] ss:$0 sm:$0xff]  ;;  %s490_s3 = smov 64   ;;  %s330_s7 = sshll.u32 %s491_s6, 4  ;;  %s331_s7 = int_to_ptr.vmem [resolvable:$true] %s330_s7 }
  0x29   :  { %359 = vmatprep.subr.mxu0 %v487_v0  ;;  %366 = vmatprep.subr.mxu1 %v487_v0  ;;  %vm320_vm3 = vcmp.ge.s32.totalorder %v317_v25, 4  ;;  %s456_s8 = scalar_lea.vmem %s331_s7, 32  ;;  %p461_p2 = scmp.lt.s32.totalorder %s331_s7, %s331_s7 }
  0x2a   :  { %360 = vmatpush3.msra.mxu0 %v58_v2  ;;  %367 = vmatpush3.msra.mxu1 %v62_v5  ;;  %p457_p1 = scmp.ne.s32.totalorder %s331_s7, %s456_s8  ;;  %p462_p3 = scmp.lt.s32.totalorder %s456_s8, %s456_s8 }
  0x2b   :  { %362 = vmatmul.mubr.msk.f32.vlgmr.msra.gmra.mxu0 %vm71_vm1, %v57_v3  ;;  %375 = vmatprep.subr.mxu0 %v487_v0 }
  0x2c   :  { %383 = vmatprep.mubr.msk.f32.mxu0 %vm488_vm0, %v487_v0  ;;  %368 = vmatprep.subr.mxu1 %v487_v0  ;;  %p463_p4 = por %p462_p3, %p461_p2 }
  0x2d   :  { %369 = vmatpush3.msra.mxu1 %v61_v6  ;;  %234 = vrot.lane.b32.xlu0 %v63_v4, %s489_s5 }
  0x2e   :  { %370 = vmatprep.subr.mxu1 %v487_v0  ;;  %146 = vrot.lane.b32.xlu1 %v340_v8, %s489_s5  ;;  %p464_p5 = pnand %p463_p4, %p457_p1 }
  0x2f   :  { %371 = vmatpush3.msra.mxu1 %v60_v7 }
  0x31   :  { %232 = vrot.lane.b32.xlu0 %v62_v5, %s489_s5 }
  0x32   :  { %230 = vrot.lane.b32.xlu1 %v61_v6, %s489_s5 }
  0x35   :  { %228 = vrot.lane.b32.xlu0 %v60_v7, %s489_s5 }
  0x36   :  { %240 = vrot.lane.b32.xlu1 %v340_v8, %s490_s3 }
  0x9f   :  { %v235_v9 = vpop.permute.xlu0 %234 }
  0xa0   :  { %376 = vmatpush3.msra.mxu0 %v235_v9  ;;  %v147_v15 = vpop.permute.xlu1 %146 }
  0xa1   :  { %377 = vmatprep.subr.mxu0 %v487_v0 }
  0xa3   :  { %v233_v10 = vpop.permute.xlu0 %232 }
  0xa4   :  { %378 = vmatpush3.msra.mxu0 %v233_v10  ;;  %v231_v16 = vpop.permute.xlu1 %230 }
  0xa5   :  { %379 = vmatprep.subr.mxu0 %v487_v0 }
  0xa6   :  { %380 = vmatpush3.msra.mxu0 %v231_v16 }
  0xa7   :  { %v229_v17 = vpop.permute.xlu0 %228  ;;  %381 = vmatprep.subr.mxu0 %v487_v0 }
  0xa8   :  { %382 = vmatpush3.msra.mxu0 %v229_v17  ;;  %v241_v23 = vpop.permute.xlu1 %240 }
  0xeb   :  { %v141_v11 = vpop.f32.mrf.mxu0 }
  0xec   :  { %v142_v12 = vadd.f32 %v340_v8, %v141_v11 }
  0xed   :  { %v363_v13 = vpop.f32.mrf.mxu0 }
  0xee   :  { %v145_v14 = vmax.f32 %v142_v12, 0.0 }
  0xf0   :  { %373 = vmatmul.mubr.msk.f32.vlgmr.msra.gmra.mxu1 %vm149_vm2, %v145_v14 }
 0x1b0   :  { %v219_v18 = vpop.f32.mrf.mxu1 }
 0x1b1   :  { %v220_v19 = vadd.f32 %v219_v18, %v147_v15 }
 0x1b2   :  { %v374_v20 = vpop.f32.mrf.mxu1 }
 0x1b3   :  { %v223_v21 = vmax.f32 %v220_v19, 0.0 }
 0x1b5   :  { %384 = vmatmul.mubr.msk.f32.vlgmr.msra.gmra.mxu0 %vm149_vm2, %v223_v21 }
 0x275   :  { %v312_v24 = vpop.f32.mrf.mxu0 }
 0x276   :  { %v313_v26 = vadd.f32 %v312_v24, %v241_v23 }
 0x277   :  { %v385_v27 = vpop.f32.mrf.mxu0 }
 0x278   :  { %v318_v28 = vmax.f32 %v313_v26, -20.0 }
 0x27a   :  { %v319_v29 = vmin.f32 %v318_v28, 2.0 }
 0x27c   :  { %v321_v30 = vsel %vm320_vm3, %v319_v29, %v313_v26 }
 0x27d   :  { %323 = vst.msk [vmem:[#allocation8] sm:$0x3] %vm322_vm4, %v321_v30 }
 0x27e   :  { %467 = shalt.err (!%p464_p5)
}
 0x27f   :  { %333 = dma.vmem_to_hbm [thread:$0]  %s331_s7, 32, %s539_s4, [#allocation4]  }
 0x280   :  { %480 = dma.done.wait [#allocation4], 32  }
 0x281   :  { %481 = vsyncadd [#allocation4], 4294967264 }
 0x282   :  { %337 = vsyncpa [#allocation3], 1 }
 0x283   :  { %338 = vsyncpa [#allocation6], 1 }
 0x284   :  { %339 = vsyncpa [#allocation4], 1 }

</bundles_post_ra>
